<compile_context>
chip_gen: v7x
topology: tpu7x:2x2x1
jax: 0.10.0
libtpu: 0.0.40
codegen_flags: <defaults>
</compile_context>

<pallas_src>
import math
import functools
import numpy as np
import jax
import jax.numpy as jnp
from jax.experimental import pallas as pl
from jax.experimental.pallas import tpu as pltpu


# ----------------------------------------------------------------------------
# Small helpers
# ----------------------------------------------------------------------------
def _round_up(x, m):
    return (x + m - 1) // m * m


def _pad2(a, rows, cols):
    return jnp.pad(a, ((0, rows - a.shape[0]), (0, cols - a.shape[1])))


def _choose_tile_n(N, H_pad, C_pad):
    """Largest token-tile whose pipelined buffers fit the 64 MiB (v7x) VMEM."""
    # Resident weights/shifts (double-buffered allocation even though fetched
    # once because the pipeline allocates 2 buffers per input).
    weight_bytes = 2 * ((2 * H_pad * H_pad + H_pad * C_pad) * 2
                        + (2 * H_pad + C_pad) * 4)
    # Per-token VMEM: double-buffered x (bf16) + out (f32) tiles, plus f32
    # h1/h2 intermediates live inside the body.
    per_token = 2 * (H_pad * 2 + C_pad * 4) + 2 * H_pad * 4
    budget = (64 << 20) - weight_bytes - (6 << 20)       # leave headroom
    max_tile = max(budget // max(per_token, 1), 256)
    tile = 256
    for cand in (4096, 2048, 1024, 512, 256):
        if cand <= max_tile:
            tile = cand
            break
    if N <= tile:                                        # single-tile case
        tile = _round_up(max(N, 8), 8)
    return int(tile)


# ----------------------------------------------------------------------------
# Pallas kernel: fused  relu(bn1(conv1)) -> relu(bn2(conv2)) -> all heads
#   x tile:      (TILE_N, H_pad)  bf16   (pipelined over the grid)
#   w1/w2:       (H_pad, H_pad)   bf16   (BN scale folded in, VMEM-resident)
#   wh:          (H_pad, C_pad)   bf16   (all 7 heads concatenated, resident)
#   t1/t2/bh:    (1, H_pad/C_pad) f32    (BN shift / head bias, resident)
#   out tile:    (TILE_N, C_pad)  f32    (lane-dense: C_pad multiple of 128)
# ----------------------------------------------------------------------------
def _predict_head_kernel(x_ref, w1_ref, t1_ref, w2_ref, t2_ref,
                         wh_ref, bh_ref, o_ref):
    x = x_ref[...]                                                    # bf16
    h1 = jnp.dot(x, w1_ref[...], preferred_element_type=jnp.float32)
    h1 = jnp.maximum(h1 + t1_ref[...], 0.0)                           # bn1 shift + relu
    h2 = jnp.dot(h1.astype(jnp.bfloat16), w2_ref[...],
                 preferred_element_type=jnp.float32)
    h2 = jnp.maximum(h2 + t2_ref[...], 0.0)                           # bn2 shift + relu
    out = jnp.dot(h2.astype(jnp.bfloat16), wh_ref[...],
                  preferred_element_type=jnp.float32)
    o_ref[...] = out + bh_ref[...]                                    # all heads


def _pallas_fused(x, w1p, t1p, w2p, t2p, whp, bhp, tile_n):
    """x: (N_pad, H_pad) bf16; returns (N_pad, C_pad) f32."""
    n_pad, h_pad = x.shape
    c_pad = whp.shape[1]
    grid = (n_pad // tile_n,)

    # VMEM budget: resident weights (+double-buffer allocation) + pipelined
    # x/out tiles + f32 intermediates, capped to v7x's 64 MiB physical VMEM.
    weight_bytes = (2 * h_pad * h_pad + h_pad * c_pad) * 2            # bf16
    shift_bytes = (2 * h_pad + c_pad) * 4
    io_tile_bytes = tile_n * (h_pad * 2 + c_pad * 4)                  # x bf16 + out f32
    interm_bytes = 2 * tile_n * h_pad * 4                             # h1/h2 f32
    vmem_limit = int(min(2 * (weight_bytes + shift_bytes)
                         + 2 * io_tile_bytes + interm_bytes + (8 << 20),
                         64 << 20))

    flops = 2 * n_pad * (2 * h_pad * h_pad + h_pad * c_pad)
    bytes_accessed = (n_pad * (h_pad * 2 + c_pad * 4)
                      + weight_bytes + shift_bytes)

    return pl.pallas_call(
        _predict_head_kernel,
        out_shape=jax.ShapeDtypeStruct((n_pad, c_pad), jnp.float32),
        grid=grid,
        in_specs=[
            pl.BlockSpec((tile_n, h_pad), lambda i: (i, 0)),   # x: tiled over N
            pl.BlockSpec((h_pad, h_pad), lambda i: (0, 0)),    # w1 (resident)
            pl.BlockSpec((1, h_pad),     lambda i: (0, 0)),    # t1 (resident)
            pl.BlockSpec((h_pad, h_pad), lambda i: (0, 0)),    # w2 (resident)
            pl.BlockSpec((1, h_pad),     lambda i: (0, 0)),    # t2 (resident)
            pl.BlockSpec((h_pad, c_pad), lambda i: (0, 0)),    # wh (resident)
            pl.BlockSpec((1, c_pad),     lambda i: (0, 0)),    # bh (resident)
        ],
        out_specs=pl.BlockSpec((tile_n, c_pad), lambda i: (i, 0)),
        compiler_params=pltpu.CompilerParams(
            dimension_semantics=("parallel",),
            vmem_limit_bytes=vmem_limit),
        cost_estimate=pl.CostEstimate(
            flops=int(flops), transcendentals=0,
            bytes_accessed=int(bytes_accessed)),
    )(x, w1p, t1p, w2p, t2p, whp, bhp)


# ----------------------------------------------------------------------------
# Parameter construction (deterministic, synthetic)
# ----------------------------------------------------------------------------
def init_params(key, hidden_dim, num_heading_bin, num_size_cluster, num_class):
    ks = jax.random.split(key, 16)

    def w(k, i, o):   # conv1d kernel-1 weight, stored as (in, out)
        return jax.random.normal(k, (i, o), jnp.float32) * 0.1

    def b(k, o):
        return jax.random.normal(k, (o,), jnp.float32) * 0.1

    H = hidden_dim
    p = {}
    p['w1'], p['b1'] = w(ks[0], H, H), b(ks[1], H)
    p['w2'], p['b2'] = w(ks[2], H, H), b(ks[3], H)
    # BatchNorm (inference) params
    for name, kg, kb, km, kv in (('bn1', ks[4], ks[5], ks[6], ks[7]),
                                 ('bn2', ks[8], ks[9], ks[10], ks[11])):
        p[name] = dict(
            gamma=1.0 + 0.1 * jax.random.normal(kg, (H,), jnp.float32),
            beta=0.1 * jax.random.normal(kb, (H,), jnp.float32),
            mean=0.1 * jax.random.normal(km, (H,), jnp.float32),
            var=jnp.abs(jax.random.normal(kv, (H,), jnp.float32)) + 0.5,
        )
    # Seven prediction heads, output channels concatenated in a fixed order:
    # [objectness(2), center(3), heading_cls(nhb), heading_res(nhb),
    #  size_cls(nsc), size_res(3*nsc), sem_cls(ncls)]
    head_dims = (2, 3, num_heading_bin, num_heading_bin,
                 num_size_cluster, 3 * num_size_cluster, num_class)
    c_out = sum(head_dims)
    kw, kb2 = jax.random.split(ks[12])
    p['wh'] = w(kw, H, c_out)
    p['bh'] = b(kb2, c_out)
    return p, head_dims


def _fold_params(params, eps=1e-5):
    """Fold BN scale into the conv weights; keep only the per-channel shift."""
    def fold(wmat, bvec, bn):
        scale = bn['gamma'] / jnp.sqrt(bn['var'] + eps)
        shift = bn['beta'] - bn['mean'] * scale
        return wmat * scale[None, :], bvec * scale + shift
    w1f, t1 = fold(params['w1'], params['b1'], params['bn1'])
    w2f, t2 = fold(params['w2'], params['b2'], params['bn2'])
    return w1f, t1, w2f, t2, params['wh'], params['bh']


def _prepare_inputs(net, params, head_dims):
    """Token-major padded bf16 activations + padded folded weights."""
    B, H, L = net.shape
    C = sum(head_dims)
    N = B * L
    H_pad = _round_up(H, 128)
    C_pad = _round_up(C, 128)
    tile_n = _choose_tile_n(N, H_pad, C_pad)
    N_pad = _round_up(N, tile_n)

    w1f, t1, w2f, t2, wh, bh = _fold_params(params)

    # transpose + pad + bf16 cast fuse into a single XLA pass over the
    # activations (the cast is needed anyway for the bf16 MXU path).
    x = jnp.transpose(net, (0, 2, 1)).reshape(N, H)
    x = _pad2(x, N_pad, H_pad).astype(jnp.bfloat16)

    w1p = _pad2(w1f, H_pad, H_pad).astype(jnp.bfloat16)
    w2p = _pad2(w2f, H_pad, H_pad).astype(jnp.bfloat16)
    whp = _pad2(wh, H_pad, C_pad).astype(jnp.bfloat16)
    t1p = _pad2(t1.reshape(1, H), 1, H_pad)
    t2p = _pad2(t2.reshape(1, H), 1, H_pad)
    bhp = _pad2(bh.reshape(1, C), 1, C_pad)
    return (x, w1p, t1p, w2p, t2p, whp, bhp), tile_n, (B, L, N, C)


@functools.partial(jax.jit, static_argnames=('head_dims',))
def _run_heads(net, params, head_dims):
    ops, tile_n, (B, L, N, C) = _prepare_inputs(net, params, head_dims)
    out = _pallas_fused(*ops, tile_n)
    return out[:N, :C].reshape(B, L, C)


# ----------------------------------------------------------------------------
# Forward (matches PredictHead.forward + decode_scores semantics)
# ----------------------------------------------------------------------------
def predict_head_forward(net, base_xyz, end_points, prefix, params, head_dims,
                         num_heading_bin, num_size_cluster, num_class,
                         mean_size_arr):
    B, H, L = net.shape                       # net: (batch, hidden, num_proposal)
    head_dims = tuple(int(d) for d in head_dims)
    out = _run_heads(net, params, head_dims)  # (B, L, C) in transpose(2,1) layout

    # split concatenated head outputs
    offs = np.cumsum([0] + list(head_dims))
    objectness_scores = out[:, :, offs[0]:offs[1]]
    center = out[:, :, offs[1]:offs[2]] + base_xyz
    heading_scores = out[:, :, offs[2]:offs[3]]
    heading_residuals_normalized = out[:, :, offs[3]:offs[4]]
    size_scores = out[:, :, offs[4]:offs[5]]
    size_residuals_normalized = out[:, :, offs[5]:offs[6]]
    sem_cls_scores = out[:, :, offs[6]:offs[7]]

    # ---- decode_scores (plain JAX glue) ----
    end_points[f'{prefix}objectness_scores'] = objectness_scores
    end_points[f'{prefix}center'] = center
    end_points[f'{prefix}heading_scores'] = heading_scores
    end_points[f'{prefix}heading_residuals_normalized'] = heading_residuals_normalized
    end_points[f'{prefix}heading_residuals'] = (
        heading_residuals_normalized * (math.pi / num_heading_bin))
    end_points[f'{prefix}size_scores'] = size_scores

    srn = size_residuals_normalized.reshape(B, L, num_size_cluster, 3)
    end_points[f'{prefix}size_residuals_normalized'] = srn
    msa = jnp.asarray(mean_size_arr, jnp.float32)[None, None, :, :]   # (1,1,nsc,3)
    size_residuals = srn * msa
    end_points[f'{prefix}size_residuals'] = size_residuals
    size_recover = size_residuals + msa
    pred_size_class = jnp.argmax(size_scores, axis=-1)                # (B, L)
    idx = pred_size_class[:, :, None, None]
    idx = jnp.broadcast_to(idx, (B, L, 1, 3))
    pred_size = jnp.take_along_axis(size_recover, idx, axis=2)[:, :, 0, :]
    end_points[f'{prefix}pred_size'] = pred_size
    end_points[f'{prefix}sem_cls_scores'] = sem_cls_scores

    return center, pred_size, end_points


# ----------------------------------------------------------------------------
# Pure-JAX reference (same bf16-operand / f32-accumulate math as the kernel)
# ----------------------------------------------------------------------------
def _reference_heads(x, w1p, t1p, w2p, t2p, whp, bhp):
    h1 = jnp.maximum(jnp.dot(x, w1p, preferred_element_type=jnp.float32) + t1p, 0.0)
    h2 = jnp.maximum(jnp.dot(h1.astype(jnp.bfloat16), w2p,
                             preferred_element_type=jnp.float32) + t2p, 0.0)
    return jnp.dot(h2.astype(jnp.bfloat16), whp,
                   preferred_element_type=jnp.float32) + bhp


if __name__ == "__main__":
    # small shapes consistent with the module
    B, H, L = 2, 32, 8          # batch, hidden_dim, num_proposal
    num_heading_bin = 4
    num_size_cluster = 4
    num_class = 6

    key = jax.random.PRNGKey(0)
    k_net, k_xyz, k_msa, k_par = jax.random.split(key, 4)

    net = jax.random.normal(k_net, (B, H, L), jnp.float32)        # NCL layout
    base_xyz = jax.random.normal(k_xyz, (B, L, 3), jnp.float32)
    mean_size_arr = np.abs(np.array(
        jax.random.normal(k_msa, (num_size_cluster, 3)))) + 0.5

    params, head_dims = init_params(k_par, H, num_heading_bin,
                                    num_size_cluster, num_class)

    end_points = {}
    center, pred_size, end_points = predict_head_forward(
        net, base_xyz, end_points, 'proposal_', params, head_dims,
        num_heading_bin, num_size_cluster, num_class, mean_size_arr)

    jax.block_until_ready((center, pred_size))

    # sanity check: kernel output matches pure-JAX reference on the same
    # padded bf16 operands (apples-to-apples bf16-MXU / f32-accumulate math)
    ops, tile_n, (B_, L_, N, C) = _prepare_inputs(net, params, head_dims)
    got = _pallas_fused(*ops, tile_n)
    want = _reference_heads(*ops)
    assert jnp.allclose(got, want, rtol=2e-2, atol=2e-3), "kernel mismatch"

    assert center.shape == (B, L, 3)
    assert pred_size.shape == (B, L, 3)
    assert end_points['proposal_objectness_scores'].shape == (B, L, 2)
    assert end_points['proposal_size_residuals'].shape == (B, L, num_size_cluster, 3)

    print("KERNEL_OK")
</pallas_src>

<mosaic_0001>
module attributes {stable_mosaic.version = 11 : i64} {
  func.func @_predict_head_kernel(%arg0: i32, %arg1: memref<16x128xbf16, #tpu.memory_space<vmem>>, %arg2: memref<128x128xbf16, #tpu.memory_space<vmem>>, %arg3: memref<1x128xf32, #tpu.memory_space<vmem>>, %arg4: memref<128x128xbf16, #tpu.memory_space<vmem>>, %arg5: memref<1x128xf32, #tpu.memory_space<vmem>>, %arg6: memref<128x128xbf16, #tpu.memory_space<vmem>>, %arg7: memref<1x128xf32, #tpu.memory_space<vmem>>, %arg8: memref<16x128xf32, #tpu.memory_space<vmem>>) attributes {dimension_semantics = [#tpu.dimension_semantics<parallel>], iteration_bounds = array<i64: 1>, scalar_prefetch = 0 : i64, scratch_operands = 0 : i64, tpu.core_type = #tpu.core_type<tc>, window_params = [{transform_indices = @transform_0, window_bounds = array<i64: 16, 128>}, {pipeline_mode = #tpu.pipeline_mode<synchronous>, transform_indices = @transform_1, window_bounds = array<i64: 128, 128>}, {pipeline_mode = #tpu.pipeline_mode<synchronous>, transform_indices = @transform_2, window_bounds = array<i64: 1, 128>}, {pipeline_mode = #tpu.pipeline_mode<synchronous>, transform_indices = @transform_3, window_bounds = array<i64: 128, 128>}, {pipeline_mode = #tpu.pipeline_mode<synchronous>, transform_indices = @transform_4, window_bounds = array<i64: 1, 128>}, {pipeline_mode = #tpu.pipeline_mode<synchronous>, transform_indices = @transform_5, window_bounds = array<i64: 128, 128>}, {pipeline_mode = #tpu.pipeline_mode<synchronous>, transform_indices = @transform_6, window_bounds = array<i64: 1, 128>}, {transform_indices = @transform_7, window_bounds = array<i64: 16, 128>}]} {
    %c0 = arith.constant 0 : index
    %c0_0 = arith.constant 0 : index
    %0 = vector.load %arg1[%c0, %c0_0] : memref<16x128xbf16, #tpu.memory_space<vmem>>, vector<16x128xbf16>
    %c0_1 = arith.constant 0 : index
    %c0_2 = arith.constant 0 : index
    %1 = vector.load %arg2[%c0_1, %c0_2] : memref<128x128xbf16, #tpu.memory_space<vmem>>, vector<128x128xbf16>
    %cst = arith.constant dense<0.000000e+00> : vector<16x128xf32>
    %2 = tpu.matmul %0, %1, %cst {dimension_numbers = #tpu.dot_dimension_numbers<[1], [0], [0], [1], [0, 0, 1, 1], [], []>} : vector<16x128xbf16>, vector<128x128xbf16>, vector<16x128xf32> -> vector<16x128xf32>
    %c0_3 = arith.constant 0 : index
    %c0_4 = arith.constant 0 : index
    %3 = vector.load %arg3[%c0_3, %c0_4] : memref<1x128xf32, #tpu.memory_space<vmem>>, vector<1x128xf32>
    %4 = vector.broadcast %3 : vector<1x128xf32> to vector<16x128xf32>
    %5 = arith.addf %2, %4 : vector<16x128xf32>
    %cst_5 = arith.constant 0.000000e+00 : f32
    %6 = vector.broadcast %cst_5 : f32 to vector<16x128xf32>
    %7 = arith.maximumf %5, %6 : vector<16x128xf32>
    %8 = arith.truncf %7 : vector<16x128xf32> to vector<16x128xbf16>
    %c0_6 = arith.constant 0 : index
    %c0_7 = arith.constant 0 : index
    %9 = vector.load %arg4[%c0_6, %c0_7] : memref<128x128xbf16, #tpu.memory_space<vmem>>, vector<128x128xbf16>
    %cst_8 = arith.constant dense<0.000000e+00> : vector<16x128xf32>
    %10 = tpu.matmul %8, %9, %cst_8 {dimension_numbers = #tpu.dot_dimension_numbers<[1], [0], [0], [1], [0, 0, 1, 1], [], []>} : vector<16x128xbf16>, vector<128x128xbf16>, vector<16x128xf32> -> vector<16x128xf32>
    %c0_9 = arith.constant 0 : index
    %c0_10 = arith.constant 0 : index
    %11 = vector.load %arg5[%c0_9, %c0_10] : memref<1x128xf32, #tpu.memory_space<vmem>>, vector<1x128xf32>
    %12 = vector.broadcast %11 : vector<1x128xf32> to vector<16x128xf32>
    %13 = arith.addf %10, %12 : vector<16x128xf32>
    %cst_11 = arith.constant 0.000000e+00 : f32
    %14 = vector.broadcast %cst_11 : f32 to vector<16x128xf32>
    %15 = arith.maximumf %13, %14 : vector<16x128xf32>
    %16 = arith.truncf %15 : vector<16x128xf32> to vector<16x128xbf16>
    %c0_12 = arith.constant 0 : index
    %c0_13 = arith.constant 0 : index
    %17 = vector.load %arg6[%c0_12, %c0_13] : memref<128x128xbf16, #tpu.memory_space<vmem>>, vector<128x128xbf16>
    %cst_14 = arith.constant dense<0.000000e+00> : vector<16x128xf32>
    %18 = tpu.matmul %16, %17, %cst_14 {dimension_numbers = #tpu.dot_dimension_numbers<[1], [0], [0], [1], [0, 0, 1, 1], [], []>} : vector<16x128xbf16>, vector<128x128xbf16>, vector<16x128xf32> -> vector<16x128xf32>
    %c0_15 = arith.constant 0 : index
    %c0_16 = arith.constant 0 : index
    %19 = vector.load %arg7[%c0_15, %c0_16] : memref<1x128xf32, #tpu.memory_space<vmem>>, vector<1x128xf32>
    %20 = vector.broadcast %19 : vector<1x128xf32> to vector<16x128xf32>
    %21 = arith.addf %18, %20 : vector<16x128xf32>
    %c0_17 = arith.constant 0 : index
    %c0_18 = arith.constant 0 : index
    %22 = vector.load %arg8[%c0_17, %c0_18] : memref<16x128xf32, #tpu.memory_space<vmem>>, vector<16x128xf32>
    tpu.vector_store %arg8[%c0_17, %c0_18], %21 {strides = array<i32>} : memref<16x128xf32, #tpu.memory_space<vmem>>, vector<16x128xf32>,
    return
  }
  func.func @transform_0(%arg0: i32) -> (i32, i32) {
    %c0_i32 = arith.constant 0 : i32
    %c0_i32_0 = arith.constant 0 : i32
    return %arg0, %c0_i32 : i32, i32
  }
  func.func @transform_1(%arg0: i32) -> (i32, i32) {
    %c0_i32 = arith.constant 0 : i32
    %c0_i32_0 = arith.constant 0 : i32
    %c0_i32_1 = arith.constant 0 : i32
    return %c0_i32, %c0_i32_0 : i32, i32
  }
  func.func @transform_2(%arg0: i32) -> (i32, i32) {
    %c0_i32 = arith.constant 0 : i32
    %c0_i32_0 = arith.constant 0 : i32
    %c0_i32_1 = arith.constant 0 : i32
    return %c0_i32, %c0_i32_0 : i32, i32
  }
  func.func @transform_3(%arg0: i32) -> (i32, i32) {
    %c0_i32 = arith.constant 0 : i32
    %c0_i32_0 = arith.constant 0 : i32
    %c0_i32_1 = arith.constant 0 : i32
    return %c0_i32, %c0_i32_0 : i32, i32
  }
  func.func @transform_4(%arg0: i32) -> (i32, i32) {
    %c0_i32 = arith.constant 0 : i32
    %c0_i32_0 = arith.constant 0 : i32
    %c0_i32_1 = arith.constant 0 : i32
    return %c0_i32, %c0_i32_0 : i32, i32
  }
  func.func @transform_5(%arg0: i32) -> (i32, i32) {
    %c0_i32 = arith.constant 0 : i32
    %c0_i32_0 = arith.constant 0 : i32
    %c0_i32_1 = arith.constant 0 : i32
    return %c0_i32, %c0_i32_0 : i32, i32
  }
  func.func @transform_6(%arg0: i32) -> (i32, i32) {
    %c0_i32 = arith.constant 0 : i32
    %c0_i32_0 = arith.constant 0 : i32
    %c0_i32_1 = arith.constant 0 : i32
    return %c0_i32, %c0_i32_0 : i32, i32
  }
  func.func @transform_7(%arg0: i32) -> (i32, i32) {
    %c0_i32 = arith.constant 0 : i32
    %c0_i32_0 = arith.constant 0 : i32
    return %arg0, %c0_i32 : i32, i32
  }
}

</mosaic_0001>

<bundles_post_ra>
// kernel: _run_heads.1
= control target key start
LH: loop header
LB: loop body
LE: loop exit
PB: predicated region body
PF: predicated region fallthrough
CT: control target
= control target key end

     0   :  { %v525_v0 = vmov 0.0   ;;  %vm526_vm0 = vmmov 0   ;;  %s687_s1 = inlined_call_operand.vmem [shape: bf16[128,128], index: 1, kind: input, shape index: {}]   ;;  %s688_s3 = inlined_call_operand.vmem [shape: bf16[128,128], index: 3, kind: input, shape index: {}]   ;;  %s689_s0 = inlined_call_operand.vmem [shape: bf16[16,128], index: 0, kind: input, shape index: {}]   ;;  %s690_s5 = inlined_call_operand.vmem [shape: bf16[128,128], index: 5, kind: input, shape index: {}]   ;;  %s691_s2 = inlined_call_operand.vmem [shape: f32[1,128], index: 2, kind: input, shape index: {}]   ;;  %s692_s4 = inlined_call_operand.vmem [shape: f32[1,128], index: 4, kind: input, shape index: {}]   ;;  %s693_s6 = inlined_call_operand.vmem [shape: f32[1,128], index: 6, kind: input, shape index: {}]   ;;  %s694_s7 = inlined_call_operand.vmem [shape: f32[16,128], index: 7, kind: output, shape index: {}]  }
   0x1   :  { %438 = vmatprep.subr.bf16.mxu0 %v525_v0  ;;  %v500_v1 = vld [vmem:[%s687_s1] sm:$0xff]   ;;  %454 = vmatprep.mubr.msk.bf16.mxu0 %vm526_vm0, %v525_v0  ;;  %v501_v2 = vld [vmem:[%s687_s1 + $0x8] sm:$0xff]   ;;  %v502_v3 = vld [vmem:[%s687_s1 + $0x10] sm:$0xff]  }
   0x2   :  { %458 = vmatprep.subr.bf16.mxu1 %v525_v0  ;;  %474 = vmatprep.mubr.msk.bf16.mxu1 %vm526_vm0, %v525_v0  ;;  %v509_v4 = vld [vmem:[%s688_s3] sm:$0xff]   ;;  %v503_v5 = vld [vmem:[%s687_s1 + $0x18] sm:$0xff]   ;;  %v510_v6 = vld [vmem:[%s688_s3 + $0x8] sm:$0xff]  }
   0x3   :  { %439 = vmatpush3.bf16.msra.mxu0 %v500_v1  ;;  %459 = vmatpush3.bf16.msra.mxu1 %v509_v4  ;;  %v504_v7 = vld [vmem:[%s687_s1 + $0x20] sm:$0xff]   ;;  %v511_v8 = vld [vmem:[%s688_s3 + $0x10] sm:$0xff]   ;;  %v505_v9 = vld [vmem:[%s687_s1 + $0x28] sm:$0xff]  }
   0x4   :  { %440 = vmatprep.subr.bf16.mxu0 %v525_v0  ;;  %460 = vmatprep.subr.bf16.mxu1 %v525_v0  ;;  %v512_v10 = vld [vmem:[%s688_s3 + $0x18] sm:$0xff]   ;;  %v506_v11 = vld [vmem:[%s687_s1 + $0x30] sm:$0xff]   ;;  %v513_v12 = vld [vmem:[%s688_s3 + $0x20] sm:$0xff]  }
   0x5   :  { %v507_v13 = vld [vmem:[%s687_s1 + $0x38] sm:$0xff]   ;;  %v514_v14 = vld [vmem:[%s688_s3 + $0x28] sm:$0xff]   ;;  %v508_v15 = vld [vmem:[%s689_s0] sm:$0xff]  }
   0x6   :  { %v515_v16 = vld [vmem:[%s688_s3 + $0x30] sm:$0xff]   ;;  %v516_v17 = vld [vmem:[%s688_s3 + $0x38] sm:$0xff]   ;;  %v517_v18 = vld [vmem:[%s690_s5] sm:$0xff]  }
   0x7   :  { %441 = vmatpush3.bf16.msra.mxu0 %v501_v2  ;;  %461 = vmatpush3.bf16.msra.mxu1 %v510_v6  ;;  %v518_v19 = vld [vmem:[%s690_s5 + $0x8] sm:$0xff]   ;;  %v519_v20 = vld [vmem:[%s690_s5 + $0x10] sm:$0xff]   ;;  %v520_v21 = vld [vmem:[%s690_s5 + $0x18] sm:$0xff]  }
   0x8   :  { %442 = vmatprep.subr.bf16.mxu0 %v525_v0  ;;  %462 = vmatprep.subr.bf16.mxu1 %v525_v0  ;;  %v521_v22 = vld [vmem:[%s690_s5 + $0x20] sm:$0xff]   ;;  %v522_v23 = vld [vmem:[%s690_s5 + $0x28] sm:$0xff]   ;;  %v523_v34 = vld [vmem:[%s690_s5 + $0x30] sm:$0xff]  }
   0x9   :  { %v383_v24 = vld [vmem:[%s691_s2] ss:$0 sm:$0xff]  ;;  %v524_v35 = vld [vmem:[%s690_s5 + $0x38] sm:$0xff]  }
   0xa   :  { %v393_v36 = vld [vmem:[%s692_s4] ss:$0 sm:$0xff] }
   0xb   :  { %443 = vmatpush3.bf16.msra.mxu0 %v502_v3  ;;  %463 = vmatpush3.bf16.msra.mxu1 %v511_v8  ;;  %v402_v46 = vld [vmem:[%s693_s6] ss:$0 sm:$0xff] }
   0xc   :  { %444 = vmatprep.subr.bf16.mxu0 %v525_v0  ;;  %464 = vmatprep.subr.bf16.mxu1 %v525_v0 }
   0xf   :  { %445 = vmatpush3.bf16.msra.mxu0 %v503_v5  ;;  %465 = vmatpush3.bf16.msra.mxu1 %v512_v10 }
  0x10   :  { %446 = vmatprep.subr.bf16.mxu0 %v525_v0  ;;  %466 = vmatprep.subr.bf16.mxu1 %v525_v0 }
  0x13   :  { %447 = vmatpush3.bf16.msra.mxu0 %v504_v7  ;;  %467 = vmatpush3.bf16.msra.mxu1 %v513_v12 }
  0x14   :  { %448 = vmatprep.subr.bf16.mxu0 %v525_v0  ;;  %468 = vmatprep.subr.bf16.mxu1 %v525_v0 }
  0x17   :  { %449 = vmatpush3.bf16.msra.mxu0 %v505_v9  ;;  %469 = vmatpush3.bf16.msra.mxu1 %v514_v14 }
  0x18   :  { %450 = vmatprep.subr.bf16.mxu0 %v525_v0  ;;  %470 = vmatprep.subr.bf16.mxu1 %v525_v0 }
  0x1b   :  { %451 = vmatpush3.bf16.msra.mxu0 %v506_v11  ;;  %471 = vmatpush3.bf16.msra.mxu1 %v515_v16 }
  0x1c   :  { %452 = vmatprep.subr.bf16.mxu0 %v525_v0  ;;  %472 = vmatprep.subr.bf16.mxu1 %v525_v0 }
  0x1f   :  { %453 = vmatpush3.bf16.msra.mxu0 %v507_v13  ;;  %473 = vmatpush3.bf16.msra.mxu1 %v516_v17 }
  0x20   :  { %478 = vmatprep.subr.bf16.mxu0 %v525_v0 }
  0x22   :  { %455 = vmatmul.mubr.bf16.vlgmr.msra.gmra.mrb[0].mxu0 %v508_v15 }
  0x23   :  { %494 = vmatprep.mubr.msk.bf16.mxu0 %vm526_vm0, %v525_v0  ;;  %479 = vmatpush3.bf16.msra.mxu0 %v517_v18 }
  0x24   :  { %480 = vmatprep.subr.bf16.mxu0 %v525_v0 }
  0x27   :  { %481 = vmatpush3.bf16.msra.mxu0 %v518_v19 }
  0x28   :  { %482 = vmatprep.subr.bf16.mxu0 %v525_v0 }
  0x2b   :  { %483 = vmatpush3.bf16.msra.mxu0 %v519_v20 }
  0x2c   :  { %484 = vmatprep.subr.bf16.mxu0 %v525_v0 }
  0x2f   :  { %485 = vmatpush3.bf16.msra.mxu0 %v520_v21 }
  0x30   :  { %486 = vmatprep.subr.bf16.mxu0 %v525_v0 }
  0x33   :  { %487 = vmatpush3.bf16.msra.mxu0 %v521_v22 }
  0x34   :  { %488 = vmatprep.subr.bf16.mxu0 %v525_v0 }
  0x37   :  { %489 = vmatpush3.bf16.msra.mxu0 %v522_v23 }
  0x38   :  { %490 = vmatprep.subr.bf16.mxu0 %v525_v0 }
  0x3b   :  { %491 = vmatpush3.bf16.msra.mxu0 %v523_v34 }
  0x3c   :  { %492 = vmatprep.subr.bf16.mxu0 %v525_v0 }
  0x3f   :  { %493 = vmatpush3.bf16.msra.mxu0 %v524_v35 }
  0xf5   :  { %v140_v25 = vpop.f32.mrb[0].mxu0 }
  0xf6   :  { %v141_v26 = vadd.f32 %v383_v24, %v140_v25  ;;  %v456_v27 = vpop.f32.mrb[1].mxu0 }
  0xf7   :  { %v143_v28 = vpop.f32.mrb[2].mxu0 }
  0xf8   :  { %v144_v29 = vadd.f32 %v383_v24, %v143_v28  ;;  %v457_v30 = vpop.f32.mrb[3].mxu0  ;;  %v147_v31 = vmax.f32 %v141_v26, 0.0 }
  0xfa   :  { %v148_v32 = vmax.f32 %v144_v29, 0.0 }
  0xfc   :  { %v149_v33 = vpack.c.bf16 %v148_v32, %v147_v31 }
  0xfe   :  { %475 = vmatmul.mubr.bf16.vlgmr.msra.gmra.mrb[0].mxu1 %v149_v33 }
 0x1d1   :  { %v255_v37 = vpop.f32.mrb[0].mxu1 }
 0x1d2   :  { %v256_v38 = vadd.f32 %v393_v36, %v255_v37  ;;  %v476_v39 = vpop.f32.mrb[1].mxu1 }
 0x1d3   :  { %v258_v40 = vpop.f32.mrb[2].mxu1 }
 0x1d4   :  { %v259_v41 = vadd.f32 %v393_v36, %v258_v40  ;;  %v477_v42 = vpop.f32.mrb[3].mxu1  ;;  %v262_v43 = vmax.f32 %v256_v38, 0.0 }
 0x1d6   :  { %v263_v44 = vmax.f32 %v259_v41, 0.0 }
 0x1d8   :  { %v264_v45 = vpack.c.bf16 %v263_v44, %v262_v43 }
 0x1da   :  { %495 = vmatmul.mubr.bf16.vlgmr.msra.gmra.mrb[4].mxu0 %v264_v45 }
 0x2ad   :  { %v370_v47 = vpop.f32.mrb[4].mxu0 }
 0x2ae   :  { %v371_v48 = vadd.f32 %v402_v46, %v370_v47  ;;  %v496_v49 = vpop.f32.mrb[5].mxu0 }
 0x2af   :  { %v373_v50 = vpop.f32.mrb[6].mxu0 }
 0x2b0   :  { %377 = vst [vmem:[%s694_s7] sm:$0xff] %v371_v48  ;;  %v374_v51 = vadd.f32 %v402_v46, %v373_v50  ;;  %v497_v52 = vpop.f32.mrb[7].mxu0 }
 0x2b2   :  { %378 = vst [vmem:[%s694_s7 + $0x8] sm:$0xff] %v374_v51 }

</bundles_post_ra>
